<compile_context>
chip_gen: v6e
topology: v6e:2x2x1
jax: 0.10.0
libtpu: 0.0.40
codegen_flags: <defaults>
</compile_context>

<pallas_src>
import jax
import jax.numpy as jnp
from jax import lax
from jax.experimental import pallas as pl
from jax.experimental.pallas import tpu as pltpu


def _probe_kernel(x_ref, ws_ref, wf_ref, bf_ref, o_ref, m_ref, l_ref, acc_ref):
    # x_ref : [TB, TS, E] VMEM, native dtype (f32 or bf16)
    # ws_ref: [1, E]      VMEM, x dtype  (score weight row; bias dropped —
    #                                     softmax is shift-invariant)
    # wf_ref: [E, O]      VMEM, f32      (final linear weight, pre-transposed)
    # bf_ref: [1, O]      VMEM, f32      (final linear bias)
    # o_ref : [TB, O]     VMEM, f32      (output rows for this batch tile)
    # scratch: m_ref [TB,1] f32, l_ref [TB,1] f32, acc_ref [TB,E] f32
    s_idx = pl.program_id(1)
    tb, _, _ = x_ref.shape

    @pl.when(s_idx == 0)
    def _init():
        m_ref[...] = jnp.full_like(m_ref, -jnp.inf)
        l_ref[...] = jnp.zeros_like(l_ref)
        acc_ref[...] = jnp.zeros_like(acc_ref)

    ws = ws_ref[...]                                       # [1, E], x dtype

    # ---- Score projection on the MXU (f32 accumulation), per batch row. ----
    # Each row: [1,E] x [TS,E] (contract E) -> [1,TS].  Rows are concatenated
    # so the softmax intermediates form a sublane-packed [TB, TS] block.
    s_rows = [
        lax.dot_general(ws, x_ref[b],
                        dimension_numbers=(((1,), (1,)), ((), ())),
                        preferred_element_type=jnp.float32)
        for b in range(tb)
    ]
    s = jnp.concatenate(s_rows, axis=0) if tb > 1 else s_rows[0]   # [TB, TS]

    # ---- Online softmax update (f32 on VPU/EUP, sublane-packed). ----
    m_prev = m_ref[...]                                    # [TB, 1]
    m_new = jnp.maximum(m_prev, jnp.max(s, axis=-1, keepdims=True))
    alpha = jnp.exp(m_prev - m_new)                        # [TB, 1]
    p = jnp.exp(s - m_new)                                 # [TB, TS] f32
    l_ref[...] = alpha * l_ref[...] + jnp.sum(p, axis=-1, keepdims=True)

    # ---- Weighted-sum contribution on the MXU, per batch row. ----
    # p is cast to x's native dtype only to feed the MXU (f32 accumulation).
    p_mm = p.astype(x_ref.dtype)                           # [TB, TS]
    c_rows = [
        lax.dot_general(p_mm[b:b + 1, :], x_ref[b],
                        dimension_numbers=(((1,), (0,)), ((), ())),
                        preferred_element_type=jnp.float32)
        for b in range(tb)
    ]
    contrib = jnp.concatenate(c_rows, axis=0) if tb > 1 else c_rows[0]  # [TB,E]
    acc_ref[...] = alpha * acc_ref[...] + contrib
    m_ref[...] = m_new

    @pl.when(s_idx == pl.num_programs(1) - 1)
    def _finalize():
        # Exact divide: runs once per batch tile, so the approx-reciprocal
        # path saves nothing and would only add error.
        weighted = acc_ref[...] / l_ref[...]               # [TB, E] f32
        out = jnp.dot(weighted, wf_ref[...],
                      preferred_element_type=jnp.float32) + bf_ref[...]
        o_ref[...] = out.astype(o_ref.dtype)               # [TB, O]


def _pick_batch_tile(batch, cap=8):
    """Largest divisor of B that is <= cap (<=8 fills the vreg sublanes)."""
    for tb in range(min(cap, batch), 0, -1):
        if batch % tb == 0:
            return tb
    return 1


def _pick_seq_tile(seq_len, max_ts):
    """Largest TS <= max_ts that divides S and is a multiple of 8 (fallback:
    the whole sequence, which always satisfies the (8,128) layout rule)."""
    if seq_len <= max_ts:
        return seq_len
    cap = max_ts - (max_ts % 8)
    for ts in range(cap, 7, -8):
        if seq_len % ts == 0:
            return ts
    # TODO(synk): support a masked/ragged last sequence tile so awkward S
    # doesn't force the whole sequence into a single (possibly huge) block.
    return seq_len


def _chip_budgets():
    """Returns (target x-block bytes, scoped-VMEM cap) per TPU generation."""
    vmem_cap = 128 * 1024 * 1024
    try:
        info = pltpu.get_tpu_info()
        vmem_cap = int(getattr(info, "vmem_capacity_bytes", vmem_cap))
    except Exception:
        pass
    if vmem_cap <= 80 * 1024 * 1024:
        # v7x-class: only 64 MiB VMEM/TC but ~3.2 TB/s HBM -> bigger blocks,
        # tighter scoped-VMEM cap so double-buffering survives.
        return 4 * 1024 * 1024, 28 * 1024 * 1024
    # v5e / v6e: 128 MiB VMEM, ~0.8-1.4 TB/s HBM.
    return 2 * 1024 * 1024, 48 * 1024 * 1024


def score_based_probe(x, w_score, b_score, w_final, b_final, *,
                      seq_tile=None, batch_tile=None):
    """x: [B, S, E] (f32 or bf16); w_score: [E]; b_score: scalar (unused in
    the kernel — softmax is shift-invariant); w_final: [O, E]; b_final: [O].
    Returns [B, O] f32."""
    del b_score  # A constant shift of every score in a row cannot change the
    #              softmax weights, hence cannot change the output.
    B, S, E = x.shape
    O = w_final.shape[0]
    itemsize = jnp.dtype(x.dtype).itemsize

    target_block_bytes, vmem_cap = _chip_budgets()

    TB = batch_tile if batch_tile is not None else _pick_batch_tile(B)
    assert B % TB == 0, (B, TB)
    if seq_tile is None:
        max_ts = max(8, target_block_bytes // max(1, TB * E * itemsize))
    else:
        max_ts = seq_tile
    TS = _pick_seq_tile(S, max_ts)
    nb, ns = B // TB, S // TS

    # Small parameter tensors, lane-friendly 2-D, resident across the grid.
    ws = w_score.reshape(1, E).astype(x.dtype)             # feed MXU in x dtype
    wf = jnp.transpose(w_final).astype(jnp.float32)        # [E, O]
    bf = b_final.reshape(1, O).astype(jnp.float32)         # [1, O]

    block_bytes = TB * TS * E * itemsize
    # Double-buffered x block + generous slack for params / f32 intermediates.
    vmem_limit = int(min(vmem_cap,
                         max(16 * 1024 * 1024, 2 * block_bytes + (8 << 20))))

    cost = pl.CostEstimate(
        flops=4 * B * S * E + 2 * B * E * O + 6 * B * S,
        transcendentals=B * S + B * ns,
        bytes_accessed=B * S * E * itemsize + (E + E * O + O) * 4 + B * O * 4,
    )

    grid_spec = pltpu.PrefetchScalarGridSpec(
        num_scalar_prefetch=0,
        grid=(nb, ns),
        in_specs=[
            # x: TB batch rows x one sequence tile, full E.  (Add
            # pipeline_mode=pl.Buffered(3) here on v5e/v6e if profiling shows
            # step-boundary DMA bubbles.)
            pl.BlockSpec((TB, TS, E), lambda b, s: (b, s, 0)),
            # score weight row, resident across the whole grid.
            pl.BlockSpec((1, E), lambda b, s: (0, 0)),
            # final linear weight / bias, resident.
            pl.BlockSpec((E, O), lambda b, s: (0, 0)),
            pl.BlockSpec((1, O), lambda b, s: (0, 0)),
        ],
        # Output kept 3-D (nb, TB, O) so the block's last two dims always
        # equal the full array dims regardless of TB; reshaped in the wrapper.
        out_specs=pl.BlockSpec((None, TB, O), lambda b, s: (b, 0, 0)),
        scratch_shapes=[
            pltpu.VMEM((TB, 1), jnp.float32),   # running max  m
            pltpu.VMEM((TB, 1), jnp.float32),   # running sum  l
            pltpu.VMEM((TB, E), jnp.float32),   # running weighted accumulator
        ],
    )

    out3 = pl.pallas_call(
        _probe_kernel,
        out_shape=jax.ShapeDtypeStruct((nb, TB, O), jnp.float32),
        grid_spec=grid_spec,
        compiler_params=pltpu.CompilerParams(
            # Batch axis "parallel" (megacore-shardable), sequence axis is the
            # online-softmax reduction -> "arbitrary".  On v7x, if the grid is
            # observed to stay on one TensorCore, switch the leading axis to
            # pltpu.CORE_PARALLEL.
            dimension_semantics=("parallel", "arbitrary"),
            vmem_limit_bytes=vmem_limit,
        ),
        cost_estimate=cost,
    )(x, ws, wf, bf)

    return out3.reshape(B, O)


def _reference(x, w_score, b_score, w_final, b_final):
    xf = x.astype(jnp.float32)
    scores = jnp.einsum('bse,e->bs', xf, w_score) + b_score
    p = jax.nn.softmax(scores, axis=-1)
    weighted = jnp.einsum('bse,bs->be', xf, p)
    return weighted @ w_final.T + b_final


def _make_params(key, B, S, E, O):
    kx, kws, kbs, kwf, kbf = jax.random.split(key, 5)
    bound = 1.0 / jnp.sqrt(float(E))   # nn.Linear-style uniform(+-1/sqrt(fan_in))
    x = jax.random.normal(kx, (B, S, E), dtype=jnp.float32)
    w_score = jax.random.uniform(kws, (E,), minval=-bound, maxval=bound,
                                 dtype=jnp.float32)
    b_score = jax.random.uniform(kbs, (), minval=-bound, maxval=bound,
                                 dtype=jnp.float32)
    w_final = jax.random.uniform(kwf, (O, E), minval=-bound, maxval=bound,
                                 dtype=jnp.float32)
    b_final = jax.random.uniform(kbf, (O,), minval=-bound, maxval=bound,
                                 dtype=jnp.float32)
    return x, w_score, b_score, w_final, b_final


if __name__ == "__main__":
    # Shapes matching the module spec: batch=2, seq=8, input_size=32, output_size=4.
    B, S, E, O = 2, 8, 32, 4
    x, w_s, b_s, w_f, b_f = _make_params(jax.random.PRNGKey(0), B, S, E, O)

    out = jax.block_until_ready(score_based_probe(x, w_s, b_s, w_f, b_f))
    ref = _reference(x, w_s, b_s, w_f, b_f)
    assert out.shape == (B, O)
    assert jnp.allclose(out, ref, atol=2e-3, rtol=2e-3), (out, ref)

    # Larger shape with a full 8-row batch tile and a forced small sequence
    # tile: exercises the multi-tile online-softmax accumulation path
    # (grid S axis > 1) with sublane-packed [TB, TS] intermediates.
    B2, S2, E2, O2 = 16, 64, 128, 8
    x2, w_s2, b_s2, w_f2, b_f2 = _make_params(jax.random.PRNGKey(0), B2, S2, E2, O2)
    out2 = jax.block_until_ready(
        score_based_probe(x2, w_s2, b_s2, w_f2, b_f2, seq_tile=16))
    ref2 = _reference(x2, w_s2, b_s2, w_f2, b_f2)
    assert out2.shape == (B2, O2)
    assert jnp.allclose(out2, ref2, atol=2e-3, rtol=2e-3), (out2, ref2)

    # Native bf16 activations streamed straight to the MXU (f32 accumulation).
    out_bf16 = jax.block_until_ready(
        score_based_probe(x2.astype(jnp.bfloat16), w_s2, b_s2, w_f2, b_f2,
                          seq_tile=16))
    assert jnp.allclose(out_bf16, ref2, atol=3e-2, rtol=3e-2), (out_bf16, ref2)

    print("KERNEL_OK")
</pallas_src>

<mosaic_0001>
module attributes {stable_mosaic.version = 11 : i64} {
  func.func @_probe_kernel(%arg0: i32, %arg1: i32, %arg2: memref<2x8x32xf32, #tpu.memory_space<vmem>>, %arg3: memref<1x32xf32, #tpu.memory_space<vmem>>, %arg4: memref<32x4xf32, #tpu.memory_space<vmem>>, %arg5: memref<1x4xf32, #tpu.memory_space<vmem>>, %arg6: memref<1x2x4xf32, #tpu.memory_space<vmem>>, %arg7: memref<2x1xf32, #tpu.memory_space<vmem>>, %arg8: memref<2x1xf32, #tpu.memory_space<vmem>>, %arg9: memref<2x32xf32, #tpu.memory_space<vmem>>) attributes {dimension_semantics = [#tpu.dimension_semantics<parallel>, #tpu.dimension_semantics<arbitrary>], iteration_bounds = array<i64: 1, 1>, scalar_prefetch = 0 : i64, scratch_operands = 3 : i64, tpu.core_type = #tpu.core_type<tc>, window_params = [{transform_indices = @transform_0, window_bounds = array<i64: 2, 8, 32>}, {pipeline_mode = #tpu.pipeline_mode<synchronous>, transform_indices = @transform_1, window_bounds = array<i64: 1, 32>}, {pipeline_mode = #tpu.pipeline_mode<synchronous>, transform_indices = @transform_2, window_bounds = array<i64: 32, 4>}, {pipeline_mode = #tpu.pipeline_mode<synchronous>, transform_indices = @transform_3, window_bounds = array<i64: 1, 4>}, {transform_indices = @transform_4, window_bounds = array<i64: 1, 2, 4>}]} {
    %c0_i32 = arith.constant 0 : i32
    %0 = arith.cmpi eq, %arg1, %c0_i32 : i32
    %1 = arith.extui %0 : i1 to i32
    %c0_i32_0 = arith.constant 0 : i32
    %2 = arith.cmpi ne, %1, %c0_i32_0 : i32
    scf.if %2 {
      %cst_32 = arith.constant 0xFF800000 : f32
      %44 = vector.broadcast %cst_32 : f32 to vector<2x1xf32>
      %c0_33 = arith.constant 0 : index
      %c0_34 = arith.constant 0 : index
      %45 = vector.load %arg7[%c0_33, %c0_34] : memref<2x1xf32, #tpu.memory_space<vmem>>, vector<2x1xf32>
      tpu.vector_store %arg7[%c0_33, %c0_34], %44 {strides = array<i32>} : memref<2x1xf32, #tpu.memory_space<vmem>>, vector<2x1xf32>,
      %cst_35 = arith.constant 0.000000e+00 : f32
      %46 = vector.broadcast %cst_35 : f32 to vector<2x1xf32>
      %c0_36 = arith.constant 0 : index
      %c0_37 = arith.constant 0 : index
      %47 = vector.load %arg8[%c0_36, %c0_37] : memref<2x1xf32, #tpu.memory_space<vmem>>, vector<2x1xf32>
      tpu.vector_store %arg8[%c0_36, %c0_37], %46 {strides = array<i32>} : memref<2x1xf32, #tpu.memory_space<vmem>>, vector<2x1xf32>,
      %cst_38 = arith.constant 0.000000e+00 : f32
      %48 = vector.broadcast %cst_38 : f32 to vector<2x32xf32>
      %c0_39 = arith.constant 0 : index
      %c0_40 = arith.constant 0 : index
      %49 = vector.load %arg9[%c0_39, %c0_40] : memref<2x32xf32, #tpu.memory_space<vmem>>, vector<2x32xf32>
      tpu.vector_store %arg9[%c0_39, %c0_40], %48 {strides = array<i32>} : memref<2x32xf32, #tpu.memory_space<vmem>>, vector<2x32xf32>,
    } else {
    }
    %c0 = arith.constant 0 : index
    %c0_1 = arith.constant 0 : index
    %3 = vector.load %arg3[%c0, %c0_1] : memref<1x32xf32, #tpu.memory_space<vmem>>, vector<1x32xf32>
    %c0_2 = arith.constant 0 : index
    %c0_3 = arith.constant 0 : index
    %c0_4 = arith.constant 0 : index
    %4 = vector.load %arg2[%c0_2, %c0_3, %c0_4] : memref<2x8x32xf32, #tpu.memory_space<vmem>>, vector<1x8x32xf32>
    %5 = vector.shape_cast %4 : vector<1x8x32xf32> to vector<8x32xf32>
    %cst = arith.constant dense<0.000000e+00> : vector<1x8xf32>
    %6 = tpu.matmul %3, %5, %cst {dimension_numbers = #tpu.dot_dimension_numbers<[1], [1], [0], [0], [0, 0, 1, 0], [], []>} : vector<1x32xf32>, vector<8x32xf32>, vector<1x8xf32> -> vector<1x8xf32>
    %c1 = arith.constant 1 : index
    %c0_5 = arith.constant 0 : index
    %c0_6 = arith.constant 0 : index
    %7 = vector.load %arg2[%c1, %c0_5, %c0_6] : memref<2x8x32xf32, #tpu.memory_space<vmem>>, vector<1x8x32xf32>
    %8 = vector.shape_cast %7 : vector<1x8x32xf32> to vector<8x32xf32>
    %cst_7 = arith.constant dense<0.000000e+00> : vector<1x8xf32>
    %9 = tpu.matmul %3, %8, %cst_7 {dimension_numbers = #tpu.dot_dimension_numbers<[1], [1], [0], [0], [0, 0, 1, 0], [], []>} : vector<1x32xf32>, vector<8x32xf32>, vector<1x8xf32> -> vector<1x8xf32>
    %10 = tpu.concatenate %6, %9 in 0 : vector<1x8xf32>, vector<1x8xf32> -> vector<2x8xf32>
    %c0_8 = arith.constant 0 : index
    %c0_9 = arith.constant 0 : index
    %11 = vector.load %arg7[%c0_8, %c0_9] : memref<2x1xf32, #tpu.memory_space<vmem>>, vector<2x1xf32>
    %cst_10 = arith.constant dense<0xFF800000> : vector<2xf32>
    %12 = vector.multi_reduction <maximumf>, %10, %cst_10 [1] : vector<2x8xf32> to vector<2xf32>
    %13 = vector.shape_cast %12 : vector<2xf32> to vector<2x1xf32>
    %14 = arith.maximumf %11, %13 : vector<2x1xf32>
    %15 = arith.subf %11, %14 : vector<2x1xf32>
    %16 = math.exp %15 : vector<2x1xf32>
    %17 = vector.broadcast %14 : vector<2x1xf32> to vector<2x8xf32>
    %18 = arith.subf %10, %17 : vector<2x8xf32>
    %19 = math.exp %18 : vector<2x8xf32>
    %c0_11 = arith.constant 0 : index
    %c0_12 = arith.constant 0 : index
    %20 = vector.load %arg8[%c0_11, %c0_12] : memref<2x1xf32, #tpu.memory_space<vmem>>, vector<2x1xf32>
    %21 = arith.mulf %16, %20 : vector<2x1xf32>
    %cst_13 = arith.constant dense<0.000000e+00> : vector<2xf32>
    %22 = vector.multi_reduction <add>, %19, %cst_13 [1] : vector<2x8xf32> to vector<2xf32>
    %23 = vector.shape_cast %22 : vector<2xf32> to vector<2x1xf32>
    %24 = arith.addf %21, %23 : vector<2x1xf32>
    %c0_14 = arith.constant 0 : index
    %c0_15 = arith.constant 0 : index
    %25 = vector.load %arg8[%c0_14, %c0_15] : memref<2x1xf32, #tpu.memory_space<vmem>>, vector<2x1xf32>
    tpu.vector_store %arg8[%c0_14, %c0_15], %24 {strides = array<i32>} : memref<2x1xf32, #tpu.memory_space<vmem>>, vector<2x1xf32>,
    %26 = vector.extract_strided_slice %19 {offsets = [0, 0], sizes = [1, 8], strides = [1, 1]} : vector<2x8xf32> to vector<1x8xf32>
    %c0_16 = arith.constant 0 : index
    %c0_17 = arith.constant 0 : index
    %c0_18 = arith.constant 0 : index
    %27 = vector.load %arg2[%c0_16, %c0_17, %c0_18] : memref<2x8x32xf32, #tpu.memory_space<vmem>>, vector<1x8x32xf32>
    %28 = vector.shape_cast %27 : vector<1x8x32xf32> to vector<8x32xf32>
    %cst_19 = arith.constant dense<0.000000e+00> : vector<1x32xf32>
    %29 = tpu.matmul %26, %28, %cst_19 {dimension_numbers = #tpu.dot_dimension_numbers<[1], [0], [0], [1], [0, 0, 1, 1], [], []>} : vector<1x8xf32>, vector<8x32xf32>, vector<1x32xf32> -> vector<1x32xf32>
    %30 = vector.extract_strided_slice %19 {offsets = [1, 0], sizes = [1, 8], strides = [1, 1]} : vector<2x8xf32> to vector<1x8xf32>
    %c1_20 = arith.constant 1 : index
    %c0_21 = arith.constant 0 : index
    %c0_22 = arith.constant 0 : index
    %31 = vector.load %arg2[%c1_20, %c0_21, %c0_22] : memref<2x8x32xf32, #tpu.memory_space<vmem>>, vector<1x8x32xf32>
    %32 = vector.shape_cast %31 : vector<1x8x32xf32> to vector<8x32xf32>
    %cst_23 = arith.constant dense<0.000000e+00> : vector<1x32xf32>
    %33 = tpu.matmul %30, %32, %cst_23 {dimension_numbers = #tpu.dot_dimension_numbers<[1], [0], [0], [1], [0, 0, 1, 1], [], []>} : vector<1x8xf32>, vector<8x32xf32>, vector<1x32xf32> -> vector<1x32xf32>
    %34 = tpu.concatenate %29, %33 in 0 : vector<1x32xf32>, vector<1x32xf32> -> vector<2x32xf32>
    %c0_24 = arith.constant 0 : index
    %c0_25 = arith.constant 0 : index
    %35 = vector.load %arg9[%c0_24, %c0_25] : memref<2x32xf32, #tpu.memory_space<vmem>>, vector<2x32xf32>
    %36 = vector.broadcast %16 : vector<2x1xf32> to vector<2x32xf32>
    %37 = arith.mulf %36, %35 : vector<2x32xf32>
    %38 = arith.addf %37, %34 : vector<2x32xf32>
    %c0_26 = arith.constant 0 : index
    %c0_27 = arith.constant 0 : index
    %39 = vector.load %arg9[%c0_26, %c0_27] : memref<2x32xf32, #tpu.memory_space<vmem>>, vector<2x32xf32>
    tpu.vector_store %arg9[%c0_26, %c0_27], %38 {strides = array<i32>} : memref<2x32xf32, #tpu.memory_space<vmem>>, vector<2x32xf32>,
    %c0_28 = arith.constant 0 : index
    %c0_29 = arith.constant 0 : index
    %40 = vector.load %arg7[%c0_28, %c0_29] : memref<2x1xf32, #tpu.memory_space<vmem>>, vector<2x1xf32>
    tpu.vector_store %arg7[%c0_28, %c0_29], %14 {strides = array<i32>} : memref<2x1xf32, #tpu.memory_space<vmem>>, vector<2x1xf32>,
    %c0_i32_30 = arith.constant 0 : i32
    %41 = arith.cmpi eq, %arg1, %c0_i32_30 : i32
    %42 = arith.extui %41 : i1 to i32
    %c0_i32_31 = arith.constant 0 : i32
    %43 = arith.cmpi ne, %42, %c0_i32_31 : i32
    scf.if %43 {
      %c0_32 = arith.constant 0 : index
      %c0_33 = arith.constant 0 : index
      %44 = vector.load %arg9[%c0_32, %c0_33] : memref<2x32xf32, #tpu.memory_space<vmem>>, vector<2x32xf32>
      %c0_34 = arith.constant 0 : index
      %c0_35 = arith.constant 0 : index
      %45 = vector.load %arg8[%c0_34, %c0_35] : memref<2x1xf32, #tpu.memory_space<vmem>>, vector<2x1xf32>
      %46 = vector.broadcast %45 : vector<2x1xf32> to vector<2x32xf32>
      %47 = arith.divf %44, %46 : vector<2x32xf32>
      %c0_36 = arith.constant 0 : index
      %c0_37 = arith.constant 0 : index
      %48 = vector.load %arg4[%c0_36, %c0_37] : memref<32x4xf32, #tpu.memory_space<vmem>>, vector<32x4xf32>
      %cst_38 = arith.constant dense<0.000000e+00> : vector<2x4xf32>
      %49 = tpu.matmul %47, %48, %cst_38 {dimension_numbers = #tpu.dot_dimension_numbers<[1], [0], [0], [1], [0, 0, 1, 1], [], []>} : vector<2x32xf32>, vector<32x4xf32>, vector<2x4xf32> -> vector<2x4xf32>
      %c0_39 = arith.constant 0 : index
      %c0_40 = arith.constant 0 : index
      %50 = vector.load %arg5[%c0_39, %c0_40] : memref<1x4xf32, #tpu.memory_space<vmem>>, vector<1x4xf32>
      %51 = vector.broadcast %50 : vector<1x4xf32> to vector<2x4xf32>
      %52 = arith.addf %49, %51 : vector<2x4xf32>
      %c0_41 = arith.constant 0 : index
      %c0_42 = arith.constant 0 : index
      %c0_43 = arith.constant 0 : index
      %53 = vector.load %arg6[%c0_41, %c0_42, %c0_43] : memref<1x2x4xf32, #tpu.memory_space<vmem>>, vector<1x2x4xf32>
      %54 = vector.shape_cast %53 : vector<1x2x4xf32> to vector<2x4xf32>
      %55 = vector.shape_cast %52 : vector<2x4xf32> to vector<1x2x4xf32>
      tpu.vector_store %arg6[%c0_41, %c0_42, %c0_43], %55 {strides = array<i32>} : memref<1x2x4xf32, #tpu.memory_space<vmem>>, vector<1x2x4xf32>,
    } else {
    }
    return
  }
  func.func @transform_0(%arg0: i32, %arg1: i32) -> (i32, i32, i32) {
    %c0_i32 = arith.constant 0 : i32
    %c0_i32_0 = arith.constant 0 : i32
    return %arg0, %arg1, %c0_i32 : i32, i32, i32
  }
  func.func @transform_1(%arg0: i32, %arg1: i32) -> (i32, i32) {
    %c0_i32 = arith.constant 0 : i32
    %c0_i32_0 = arith.constant 0 : i32
    %c0_i32_1 = arith.constant 0 : i32
    return %c0_i32, %c0_i32_0 : i32, i32
  }
  func.func @transform_2(%arg0: i32, %arg1: i32) -> (i32, i32) {
    %c0_i32 = arith.constant 0 : i32
    %c0_i32_0 = arith.constant 0 : i32
    %c0_i32_1 = arith.constant 0 : i32
    return %c0_i32, %c0_i32_0 : i32, i32
  }
  func.func @transform_3(%arg0: i32, %arg1: i32) -> (i32, i32) {
    %c0_i32 = arith.constant 0 : i32
    %c0_i32_0 = arith.constant 0 : i32
    %c0_i32_1 = arith.constant 0 : i32
    return %c0_i32, %c0_i32_0 : i32, i32
  }
  func.func @transform_4(%arg0: i32, %arg1: i32) -> (i32, i32, i32) {
    %c0_i32 = arith.constant 0 : i32
    %c0_i32_0 = arith.constant 0 : i32
    %c0_i32_1 = arith.constant 0 : i32
    return %arg0, %c0_i32, %c0_i32_0 : i32, i32, i32
  }
}

</mosaic_0001>

<bundles_post_ra>
// kernel: tpu_custom_call.1
= control target key start
LH: loop header
LB: loop body
LE: loop exit
PB: predicated region body
PF: predicated region fallthrough
CT: control target
= control target key end

     0   :  { %vm29_vm0 = vcmask 261120   ;;  %v576_v1 = vmov 0.0   ;;  %vm577_vm1 = vmmov 0   ;;  %s668_s0 = inlined_call_operand.vmem [shape: f32[2,8,32], index: 0, kind: input, shape index: {}]   ;;  %s669_s1 = inlined_call_operand.vmem [shape: f32[1,32], index: 1, kind: input, shape index: {}]   ;;  %s670_s2 = inlined_call_operand.vmem [shape: f32[32,4], index: 2, kind: input, shape index: {}]   ;;  %s671_s3 = inlined_call_operand.vmem [shape: f32[1,4], index: 3, kind: input, shape index: {}]   ;;  %s672_s4 = inlined_call_operand.hbm [shape: f32[1,2,4], index: 4, kind: output, shape index: {}]  }
   0x1   :  { %v28_v0 = vld [vmem:[%s668_s0] sm:$0xff]  ;;  %510 = vmatprep.subr.mxu1 %v576_v1  ;;  %512 = vmatprep.mubr.msk.f32.mxu1 %vm577_vm1, %v576_v1 }
   0x2   :  { %9 = vsyncpa [#allocation6], 0  ;;  %511 = vmatpush3.xpose.msk.msra.mxu1 %vm29_vm0, %v28_v0  ;;  %v27_v2 = vld [vmem:[%s669_s1] sm:$0x1]  ;;  %520 = vmatprep.subr.mxu0 %v576_v1  ;;  %v489_v3 = vld [vmem:[%s668_s0 + $0x8] sm:$0xff]  ;;  %vm184_vm2 = vcmask 1040384  }
   0x3   :  { %515 = vmatprep.subr.mxu1 %v576_v1  ;;  %521 = vmatpush3.msra.mxu0 %v28_v0  ;;  %vm187_vm3 = vcmask 58368   ;;  %vm22_vm4 = vcmask 1024   ;;  %v578_v11 = vmov -inf   ;;  %v579_v12 = vmov 0   ;;  %v390_v30 = vld [vmem:[%s670_s2 + $0x18] sm:$0xff]  ;;  %v389_v31 = vld [vmem:[%s670_s2 + $0x10] sm:$0xff] }
   0x4   :  { %522 = vmatprep.mubr.msk.f32.mxu0 %vm577_vm1, %v576_v1  ;;  %530 = vmatprep.subr.mxu0 %v576_v1  ;;  %23 = vst.msk [vmem:[#allocation2] sm:$0x3] %vm22_vm4, %v578_v11  ;;  %24 = vst.msk [vmem:[#allocation3] sm:$0x3] %vm22_vm4, %v576_v1  ;;  %vm212_vm5 = vcmask 64512   ;;  %vm25_vm6 = vcmask 254976  }
   0x5   :  { %513 = vmatmul.mubr.msk.f32.vlgmr.msra.gmra.mxu1 %vm29_vm0, %v27_v2  ;;  %546 = vset.pattern.permute.xlu0 %v579_v12  ;;  %26 = vst.msk [vmem:[#allocation4] sm:$0x3] %vm25_vm6, %v576_v1  ;;  %v388_v32 = vld [vmem:[%s670_s2 + $0x8] sm:$0xff]  ;;  %v387_v33 = vld [vmem:[%s670_s2] sm:$0xff]  ;;  %s580_s28 = smov [#allocation5]   ;;  %vm471_vm7 = vcmask 25600  }
   0x6   :  { %516 = vmatpush3.xpose.msk.msra.mxu1 %vm29_vm0, %v489_v3  ;;  %517 = vmatprep.mubr.msk.f32.mxu1 %vm577_vm1, %v576_v1  ;;  %v495_v48 = vld [vmem:[%s671_s3] ss:$0 sm:$0xff]  ;;  %s479_s29 = sshll.u32 %s580_s28, 4  ;;  %s480_s29 = int_to_ptr.vmem [resolvable:$true] %s479_s29 }
   0x7   :  { %525 = vmatprep.subr.mxu1 %v576_v1  ;;  %547 = vset.pattern.permute.xlu1 %v579_v12  ;;  %s554_s30 = scalar_lea.vmem %s480_s29, 32  ;;  %p559_p1 = scmp.lt.s32.totalorder %s480_s29, %s480_s29 }
   0x8   :  { %p555_p0 = scmp.ne.s32.totalorder %s480_s29, %s554_s30  ;;  %p560_p2 = scmp.lt.s32.totalorder %s554_s30, %s554_s30 }
   0x9   :  { %518 = vmatmul.mubr.msk.f32.vlgmr.msra.gmra.mxu1 %vm29_vm0, %v27_v2 }
   0xa   :  { %526 = vmatpush3.msra.mxu1 %v489_v3  ;;  %527 = vmatprep.mubr.msk.f32.mxu1 %vm577_vm1, %v576_v1  ;;  %p561_p3 = por %p560_p2, %p559_p1 }
   0xb   :  { %v186_v13 = vld [vmem:[#allocation2] sm:$0x3]  ;;  %v203_v25 = vld [vmem:[#allocation3] sm:$0x3] }
   0xc   :  { %v364_v41 = vld [vmem:[#allocation4] sm:$0x3]  ;;  %p562_p4 = pnand %p561_p3, %p555_p0 }
  0xc5   :  { %v102_v4 = vpop.f32.mrf.mxu1 }
  0xc7   :  { %v514_v5 = vpop.f32.mrf.mxu1 }
  0xc9   :  { %v177_v6 = vpop.f32.mrf.mxu1 }
  0xca   :  { %v182_v7 = vrot.slane %v177_v6, 7 }
  0xcb   :  { %v519_v8 = vpop.f32.mrf.mxu1 }
  0xcc   :  { %v185_v9 = vsel %vm184_vm2, %v102_v4, %v182_v7 }
  0xcd   :  { %v188_v10 = vsel %vm187_vm3, %v185_v9, -inf }
  0xce   :  { %189 = vmax.xlane.f32.xlu0 %v188_v10 }
 0x157   :  { %v190_v14 = vpop.xlane.xlu0 %189 }
 0x158   :  { %v191_v15 = vmax.f32 %v186_v13, %v190_v14 }
 0x15a   :  { %v192_v16 = vsub.f32 %v186_v13, %v191_v15  ;;  %374 = vst.msk [vmem:[#allocation2] sm:$0x3] %vm22_vm4, %v191_v15  ;;  %197 = vperm.xlu0 %546, %v191_v15  }
 0x15c   :  { %v193_v23 = vmul.f32 1.442695, %v192_v16 }
 0x1d5   :  { %v198_v17 = vpop.permute.xlu0 %197 }
 0x1d6   :  { %v200_v18 = vsub.f32 %v185_v9, %v198_v17 }
 0x1d8   :  { %v201_v19 = vmul.f32 1.442695, %v200_v18 }
 0x1da   :  { %548 = vpow2.f32 %v201_v19 }
 0x1db   :  { %550 = vpow2.f32 %v193_v23 }
 0x1e7   :  { %v549_v20 = vpop.eup %548 }
 0x1e8   :  { %523 = vmatmul.mubr.msk.f32.vlgmr.msra.gmra.mxu0 %vm212_vm5, %v549_v20  ;;  %v205_v21 = vsel %vm187_vm3, %v549_v20, 0.0  ;;  %v287_v22 = vrot.slane %v549_v20, 1  ;;  %v551_v24 = vpop.eup %550 }
 0x1e9   :  { %206 = vadd.xlane.f32.xlu1 %v205_v21  ;;  %538 = vmatprep.mubr.msk.f32.mxu0 %vm577_vm1, %v576_v1  ;;  %v204_v26 = vmul.f32 %v551_v24, %v203_v25 }
 0x1ea   :  { %528 = vmatmul.mubr.msk.f32.vlgmr.msra.gmra.mxu1 %vm212_vm5, %v287_v22  ;;  %531 = vmatpush3.msra.mxu0 %v390_v30 }
 0x1eb   :  { %532 = vmatprep.subr.mxu0 %v576_v1 }
 0x1ec   :  { %533 = vmatpush3.msra.mxu0 %v389_v31 }
 0x1ed   :  { %534 = vmatprep.subr.mxu0 %v576_v1 }
 0x1ee   :  { %535 = vmatpush3.msra.mxu0 %v388_v32 }
 0x1ef   :  { %536 = vmatprep.subr.mxu0 %v576_v1 }
 0x1f0   :  { %537 = vmatpush3.msra.mxu0 %v387_v33 }
 0x272   :  { %v207_v27 = vpop.xlane.xlu1 %206 }
 0x273   :  { %v208_v28 = vadd.f32 %v207_v27, %v204_v26 }
 0x275   :  { %210 = vst.msk [vmem:[#allocation3] sm:$0x3] %vm22_vm4, %v208_v28 }
 0x27c   :  { %v379_v29 = vld [vmem:[#allocation3] sm:$0x3] }
 0x27d   :  { %382 = vperm.xlu1 %547, %v379_v29  }
 0x281   :  { %367 = vperm.xlu1 %547, %v551_v24  }
 0x2a8   :  { %v282_v34 = vpop.f32.mrf.mxu0 }
 0x2aa   :  { %v524_v35 = vpop.f32.mrf.mxu0  ;;  %v356_v36 = vpop.f32.mrf.mxu1 }
 0x2ab   :  { %v361_v37 = vrot.slane %v356_v36, 7 }
 0x2ac   :  { %v529_v38 = vpop.f32.mrf.mxu1 }
 0x2ad   :  { %v363_v39 = vsel %vm184_vm2, %v282_v34, %v361_v37 }
 0x2f8   :  { %v383_v40 = vpop.permute.xlu1 %382 }
 0x2f9   :  { %552 = vrcp.f32 %v383_v40 }
 0x2fc   :  { %v368_v42 = vpop.permute.xlu1 %367 }
 0x2fd   :  { %v370_v43 = vmul.f32 %v368_v42, %v364_v41 }
 0x2ff   :  { %v371_v44 = vadd.f32 %v370_v43, %v363_v39 }
 0x301   :  { %373 = vst.msk [vmem:[#allocation4] sm:$0x3] %vm25_vm6, %v371_v44 }
 0x306   :  { %v553_v45 = vpop.eup %552 }
 0x308   :  { %v378_v46 = vld [vmem:[#allocation4] sm:$0x3] }
 0x309   :  { %v386_v47 = vmul.f32 %v553_v45, %v378_v46 }
 0x30b   :  { %539 = vmatmul.mubr.msk.f32.vlgmr.msra.gmra.mxu0 %vm29_vm0, %v386_v47 }
 0x3cb   :  { %v467_v49 = vpop.f32.mrf.mxu0 }
 0x3cc   :  { %v468_v50 = vadd.f32 %v495_v48, %v467_v49 }
 0x3cd   :  { %v540_v51 = vpop.f32.mrf.mxu0 }
 0x3ce   :  { %472 = vst.msk [vmem:[#allocation5] sm:$0x3] %vm471_vm7, %v468_v50 }
 0x3cf   :  { %565 = shalt.err (!%p562_p4)
}
 0x3d0   :  { %482 = dma.vmem_to_hbm [thread:$0]  %s480_s29, 32, %s672_s4, [#allocation6]  }
 0x3d1   :  { %574 = dma.done.wait [#allocation6], 32  }
 0x3d2   :  { %575 = vsyncadd [#allocation6], 4294967264 }
 0x3d3   :  { %486 = vsyncpa [#allocation6], 1 }

</bundles_post_ra>
